<compile_context>
chip_gen: v6e
topology: v6e:2x2x1
jax: 0.10.0
libtpu: 0.0.40
codegen_flags: <defaults>
</compile_context>

<pallas_src>
import functools

import jax
import jax.numpy as jnp
from jax.experimental import pallas as pl
from jax.experimental.pallas import tpu as pltpu


def _relu_kernel(x_ref, o_ref, *, invert: bool):
    x = x_ref[...]
    if invert:
        # relu(-sign(x)*abs(x)) == relu(-x)  (x==0 lands on 0 either way)
        x = -x
    o_ref[...] = jnp.maximum(x, 0).astype(o_ref.dtype)


def _ceil_to(a: int, m: int) -> int:
    return ((a + m - 1) // m) * m


def pallas_relu(
    x: jax.Array,
    invert_activation: bool = False,
    *,
    target_block_bytes: int = 4 << 20,
) -> jax.Array:
    """Elementwise ReLU (with optional sign inversion) as a Pallas TPU kernel.

    Accepts any shape/dtype; flattens to a lane-dense (rows, lane_width) slab
    (padding with zeros only when the element count is not lane/sublane aligned)
    and tiles it with large, sublane-aligned blocks.
    """
    orig_shape = x.shape
    dtype = x.dtype
    n = x.size
    if n == 0:
        return x

    itemsize = jnp.dtype(dtype).itemsize
    # Minimum sublane tile per dtype: 8 (f32), 16 (bf16/f16), 32 (int8/fp8).
    min_sublane = max(8, 32 // max(itemsize, 1))

    # Prefer a lane width that lets us reshape without any padding copy.
    lane_width = None
    for lw in (512, 256, 128):
        if n % lw == 0 and (n // lw) % min_sublane == 0:
            lane_width = lw
            break

    if lane_width is None:
        # Fallback: pad once to a 512-lane, sublane-aligned slab.
        lane_width = 512
        rows = _ceil_to(pl.cdiv(n, lane_width), min_sublane)
        padded_n = rows * lane_width
        x_flat = jnp.pad(x.reshape(-1), (0, padded_n - n))
    else:
        rows = n // lane_width
        padded_n = n
        x_flat = x.reshape(-1)

    x2 = x_flat.reshape(rows, lane_width)

    # Tile rows: ~target_block_bytes per block, sublane-aligned, capped at total rows.
    tile_rows = max(min_sublane, target_block_bytes // (lane_width * itemsize))
    tile_rows = max(min_sublane, (tile_rows // min_sublane) * min_sublane)
    tile_rows = min(tile_rows, rows)

    grid = (pl.cdiv(rows, tile_rows),)
    kernel = functools.partial(_relu_kernel, invert=bool(invert_activation))

    out = pl.pallas_call(
        kernel,
        out_shape=jax.ShapeDtypeStruct((rows, lane_width), dtype),
        grid_spec=pltpu.PrefetchScalarGridSpec(
            num_scalar_prefetch=0,
            grid=grid,
            in_specs=[pl.BlockSpec((tile_rows, lane_width), lambda i: (i, 0))],
            out_specs=pl.BlockSpec((tile_rows, lane_width), lambda i: (i, 0)),
        ),
        compiler_params=pltpu.CompilerParams(
            dimension_semantics=("parallel",),
            # 2 arrays (in+out) x 2 pipeline buffers x <=4 MiB blocks ~= 16 MiB,
            # plus headroom; fits v5e/v6e (128 MiB) and v7x (64 MiB physical).
            vmem_limit_bytes=32 * 1024 * 1024,
        ),
    )(x2)

    if padded_n != n:
        out = out.reshape(-1)[:n]
    return out.reshape(orig_shape)


if __name__ == "__main__":
    key = jax.random.PRNGKey(0)
    # NCHW input, small shapes: batch=2, channels=4, spatial=16x16
    x = jax.random.normal(key, (2, 4, 16, 16), dtype=jnp.float32)

    # invertActivation=False (default module config)
    y = jax.block_until_ready(pallas_relu(x, invert_activation=False))
    y_ref = jnp.maximum(x, 0.0)
    assert jnp.allclose(y, y_ref), "ReLU mismatch"

    # invertActivation=True path
    y_inv = jax.block_until_ready(pallas_relu(x, invert_activation=True))
    y_inv_ref = jnp.maximum(-jnp.sign(x) * jnp.abs(x), 0.0)
    assert jnp.allclose(y_inv, y_inv_ref), "Inverted ReLU mismatch"

    # Odd element count (not a multiple of 128) exercises the pad-and-tile path.
    x_odd = jax.random.normal(jax.random.PRNGKey(0), (3, 5, 7), dtype=jnp.float32)
    y_odd = jax.block_until_ready(pallas_relu(x_odd))
    assert jnp.allclose(y_odd, jnp.maximum(x_odd, 0.0)), "Odd-size ReLU mismatch"

    print("KERNEL_OK")
</pallas_src>

<mosaic_0001>
module attributes {stable_mosaic.version = 11 : i64} {
  func.func @_relu_kernel(%arg0: i32, %arg1: memref<8x256xf32, #tpu.memory_space<vmem>>, %arg2: memref<8x256xf32, #tpu.memory_space<vmem>>) attributes {dimension_semantics = [#tpu.dimension_semantics<parallel>], iteration_bounds = array<i64: 1>, scalar_prefetch = 0 : i64, scratch_operands = 0 : i64, tpu.core_type = #tpu.core_type<tc>, window_params = [{transform_indices = @transform_0, window_bounds = array<i64: 8, 256>}, {transform_indices = @transform_1, window_bounds = array<i64: 8, 256>}]} {
    %c0 = arith.constant 0 : index
    %c0_0 = arith.constant 0 : index
    %0 = vector.load %arg1[%c0, %c0_0] : memref<8x256xf32, #tpu.memory_space<vmem>>, vector<8x256xf32>
    %cst = arith.constant 0.000000e+00 : f32
    %1 = vector.broadcast %cst : f32 to vector<8x256xf32>
    %2 = arith.maximumf %0, %1 : vector<8x256xf32>
    %c0_1 = arith.constant 0 : index
    %c0_2 = arith.constant 0 : index
    %3 = vector.load %arg2[%c0_1, %c0_2] : memref<8x256xf32, #tpu.memory_space<vmem>>, vector<8x256xf32>
    tpu.vector_store %arg2[%c0_1, %c0_2], %2 {strides = array<i32>} : memref<8x256xf32, #tpu.memory_space<vmem>>, vector<8x256xf32>,
    return
  }
  func.func @transform_0(%arg0: i32) -> (i32, i32) {
    %c0_i32 = arith.constant 0 : i32
    %c0_i32_0 = arith.constant 0 : i32
    return %arg0, %c0_i32 : i32, i32
  }
  func.func @transform_1(%arg0: i32) -> (i32, i32) {
    %c0_i32 = arith.constant 0 : i32
    %c0_i32_0 = arith.constant 0 : i32
    return %arg0, %c0_i32 : i32, i32
  }
}

</mosaic_0001>

<bundles_post_ra>
// kernel: tpu_custom_call.1
= control target key start
LH: loop header
LB: loop body
LE: loop exit
PB: predicated region body
PF: predicated region fallthrough
CT: control target
= control target key end

     0   :  { %6 = vsyncpa [#allocation3], 0  ;;  %s106_s0 = inlined_call_operand.hbm [shape: f32[8,256], index: 0, kind: input, shape index: {}]   ;;  %s107_s1 = inlined_call_operand.hbm [shape: f32[8,256], index: 1, kind: output, shape index: {}]  }
   0x1   :  { %7 = vsyncpa [#allocation4], 0  ;;  %s88_s6 = smov [#allocation2]  }
   0x2   :  { %s14_s7 = sshll.u32 %s88_s6, 4  ;;  %s15_s7 = int_to_ptr.vmem [resolvable:$true] %s14_s7 }
   0x3   :  { %s52_s8 = scalar_lea.vmem %s15_s7, 256  ;;  %p57_p1 = scmp.lt.s32.totalorder %s15_s7, %s15_s7 }
   0x4   :  { %p53_p0 = scmp.ne.s32.totalorder %s15_s7, %s52_s8  ;;  %p58_p2 = scmp.lt.s32.totalorder %s52_s8, %s52_s8 }
   0x6   :  { %p59_p3 = por %p58_p2, %p57_p1 }
   0x8   :  { %p60_p4 = pnand %p59_p3, %p53_p0 }
   0xa   :  { %63 = shalt.err (!%p60_p4)
}
   0xb   :  { %17 = dma.hbm_to_vmem [thread:$0]  %s106_s0, 256, %s15_s7, [#allocation3]  }
   0xc   :  { %84 = dma.done.wait [#allocation3], 256  }
   0xd   :  { %85 = vsyncadd [#allocation3], 4294967040  ;;  %s89_s11 = smov [#allocation5]   ;;  %v21_v0 = vld [vmem:[#allocation2] sm:$0xff]  ;;  %v22_v1 = vld [vmem:[#allocation2 + $0x8] sm:$0xff] }
   0xe   :  { %s33_s12 = sshll.u32 %s89_s11, 4  ;;  %v23_v2 = vmax.f32 %v21_v0, 0.0  ;;  %v24_v3 = vmax.f32 %v22_v1, 0.0  ;;  %s34_s12 = int_to_ptr.vmem [resolvable:$true] %s33_s12 }
   0xf   :  { %s64_s13 = scalar_lea.vmem %s34_s12, 256  ;;  %p69_p6 = scmp.lt.s32.totalorder %s34_s12, %s34_s12 }
  0x10   :  { %25 = vst [vmem:[#allocation5] sm:$0xff] %v23_v2  ;;  %26 = vst [vmem:[#allocation5 + $0x8] sm:$0xff] %v24_v3  ;;  %p65_p5 = scmp.ne.s32.totalorder %s34_s12, %s64_s13  ;;  %p70_p7 = scmp.lt.s32.totalorder %s64_s13, %s64_s13 }
  0x12   :  { %p71_p8 = por %p70_p7, %p69_p6 }
  0x14   :  { %p72_p9 = pnand %p71_p8, %p65_p5 }
  0x16   :  { %75 = shalt.err (!%p72_p9)
}
  0x17   :  { %36 = dma.vmem_to_hbm [thread:$0]  %s34_s12, 256, %s107_s1, [#allocation4]  }
  0x18   :  { %86 = dma.done.wait [#allocation4], 256  }
  0x19   :  { %87 = vsyncadd [#allocation4], 4294967040 }
  0x1a   :  { %40 = vsyncpa [#allocation3], 1 }
  0x1b   :  { %41 = vsyncpa [#allocation4], 1 }

</bundles_post_ra>
